<compile_context>
chip_gen: v5e
topology: v5e:2x2
jax: 0.10.0
libtpu: 0.0.40
codegen_flags: <defaults>
</compile_context>

<pallas_src>
import functools

import jax
import jax.numpy as jnp
from jax import lax
from jax.experimental import pallas as pl
from jax.experimental.pallas import tpu as pltpu

_LANES_WIDE = 1024      # lane-dense last dim for large inputs
_LANES_NARROW = 128     # keeps padding small for tiny inputs
_BLOCK_ROWS_MAX = 512   # (512, 1024) f32 block = 2 MiB -> ~8 MiB double-buffered


def _dropout_kernel(seed_ref, x_ref, o_ref, *, threshold, multiplier,
                    block_rows, lanes):
    shape = x_ref.shape
    i = pl.program_id(0)
    row = lax.broadcasted_iota(jnp.int32, shape, 0)
    col = lax.broadcasted_iota(jnp.int32, shape, 1)
    # Global element index: unique across the whole slab, independent of tiling,
    # so every grid block (and each v7x TensorCore) gets a distinct stream.
    idx = (i * block_rows + row) * lanes + col
    h = idx.astype(jnp.uint32) + seed_ref[0].astype(jnp.uint32)
    # triple32 integer hash (full-avalanche finalizer) -> uniform 32-bit bits.
    h = h ^ (h >> 17)
    h = h * jnp.uint32(0xED5AD4BB)
    h = h ^ (h >> 11)
    h = h * jnp.uint32(0xAC4C1B51)
    h = h ^ (h >> 15)
    h = h * jnp.uint32(0x31848BAB)
    h = h ^ (h >> 14)
    keep = h > jnp.uint32(threshold)          # P(keep) ~= 1 - p
    x = x_ref[...]
    o_ref[...] = jnp.where(keep, x * multiplier, 0.0).astype(o_ref.dtype)


def my_dropout(x, seed, p=0.5, training=True):
    """Pallas implementation of MyDropout.forward.

    x:        float array, any shape (e.g. NCHW [N, C, H, W]).
    seed:     python int used to derive the dropout mask.
    p:        drop probability.
    training: if False, returns x unchanged (matches nn.Module.eval()).
    """
    if not training:
        return x

    p = float(p)
    multiplier = (1.0 / (1.0 - p)) if p < 1.0 else 0.0
    threshold = min(max(int(p * (1 << 32)), 0), (1 << 32) - 1)

    # Pre-mix the seed on the host (golden-ratio scramble); store its uint32
    # bit pattern in an int32 SMEM scalar.
    mixed = (int(seed) * 0x9E3779B9) & 0xFFFFFFFF
    if mixed >= (1 << 31):
        mixed -= (1 << 32)
    seed_arr = jnp.asarray([mixed], dtype=jnp.int32)

    orig_shape = x.shape
    total = x.size

    # Lane-dense 2D layout, tiled along rows.
    lanes = _LANES_WIDE if total >= 8 * _LANES_WIDE else _LANES_NARROW
    rows = pl.cdiv(total, lanes)
    rows = pl.cdiv(rows, 8) * 8                      # sublane-align
    block_rows = min(_BLOCK_ROWS_MAX, rows)
    num_blocks = pl.cdiv(rows, block_rows)
    rows = num_blocks * block_rows                   # grid divides evenly
    padded_total = rows * lanes

    flat = x.reshape(-1)
    if padded_total != total:
        flat = jnp.pad(flat, (0, padded_total - total))
    x2d = flat.reshape(rows, lanes)

    kernel = functools.partial(
        _dropout_kernel, threshold=threshold, multiplier=multiplier,
        block_rows=block_rows, lanes=lanes)

    out2d = pl.pallas_call(
        kernel,
        out_shape=jax.ShapeDtypeStruct((rows, lanes), x.dtype),
        grid=(num_blocks,),
        in_specs=[
            pl.BlockSpec(memory_space=pltpu.MemorySpace.SMEM),     # seed scalar
            pl.BlockSpec((block_rows, lanes), lambda i: (i, 0)),   # input tile
        ],
        out_specs=pl.BlockSpec((block_rows, lanes), lambda i: (i, 0)),
        compiler_params=pltpu.CompilerParams(
            dimension_semantics=("parallel",),       # shard blocks across TCs on v7x
        ),
        cost_estimate=pl.CostEstimate(
            flops=10 * padded_total,
            transcendentals=0,
            bytes_accessed=2 * padded_total * x.dtype.itemsize,
        ),
    )(seed_arr, x2d)

    out = out2d.reshape(-1)
    if padded_total != total:
        out = out[:total]
    return out.reshape(orig_shape)


if __name__ == "__main__":
    key = jax.random.PRNGKey(0)
    # Small NCHW input consistent with a conv-net feature map.
    x = jax.random.normal(key, (2, 4, 16, 16), dtype=jnp.float32)

    p = 0.5
    out = jax.block_until_ready(my_dropout(x, seed=1234, p=p, training=True))

    # Sanity checks on dropout semantics.
    assert out.shape == x.shape and out.dtype == x.dtype
    mult = 1.0 / (1.0 - p)
    is_zero = (out == 0.0)
    is_scaled = jnp.isclose(out, x * mult, rtol=1e-5, atol=1e-6)
    # Every output element is either 0 (dropped) or input * multiplier (kept).
    assert bool(jnp.all(is_zero | is_scaled))
    keep_frac = float(jnp.mean(jnp.logical_and(is_scaled, ~is_zero).astype(jnp.float32)))
    assert 0.3 < keep_frac < 0.7, keep_frac  # ~1-p of elements kept

    # Different seeds give different masks.
    out2 = jax.block_until_ready(my_dropout(x, seed=4321, p=p, training=True))
    assert bool(jnp.any(out2 != out))

    # Eval mode is identity.
    out_eval = jax.block_until_ready(my_dropout(x, seed=1234, p=p, training=False))
    assert bool(jnp.all(out_eval == x))

    print("KERNEL_OK")
</pallas_src>

<mosaic_0001>
module attributes {stable_mosaic.version = 11 : i64} {
  func.func @_dropout_kernel(%arg0: i32, %arg1: memref<1xi32, #tpu.memory_space<smem>>, %arg2: memref<16x128xf32, #tpu.memory_space<vmem>>, %arg3: memref<16x128xf32, #tpu.memory_space<vmem>>) attributes {dimension_semantics = [#tpu.dimension_semantics<parallel>], iteration_bounds = array<i64: 1>, scalar_prefetch = 0 : i64, scratch_operands = 0 : i64, tpu.core_type = #tpu.core_type<tc>, window_params = [{transform_indices = @transform_0, window_bounds = array<i64: 1>}, {transform_indices = @transform_1, window_bounds = array<i64: 16, 128>}, {transform_indices = @transform_2, window_bounds = array<i64: 16, 128>}]} {
    %0 = tpu.iota {dimensions = array<i32: 0>} : vector<16x128xi32>
    %1 = tpu.iota {dimensions = array<i32: 1>} : vector<16x128xi32>
    %c16_i32 = arith.constant 16 : i32
    %2 = arith.muli %arg0, %c16_i32 : i32
    %3 = vector.broadcast %2 : i32 to vector<16x128xi32>
    %4 = arith.addi %3, %0 : vector<16x128xi32>
    %c128_i32 = arith.constant 128 : i32
    %5 = vector.broadcast %c128_i32 : i32 to vector<16x128xi32>
    %6 = arith.muli %4, %5 : vector<16x128xi32>
    %7 = arith.addi %6, %1 : vector<16x128xi32>
    %c0 = arith.constant 0 : index
    %8 = memref.load %arg1[%c0] : memref<1xi32, #tpu.memory_space<smem>>
    %9 = vector.broadcast %8 : i32 to vector<16x128xi32>
    %10 = arith.addi %7, %9 : vector<16x128xi32>
    %c17_i32 = arith.constant 17 : i32
    %11 = vector.broadcast %c17_i32 : i32 to vector<16x128xi32>
    %12 = arith.shrui %10, %11 : vector<16x128xi32>
    %13 = arith.xori %10, %12 : vector<16x128xi32>
    %c-312814405_i32 = arith.constant -312814405 : i32
    %14 = vector.broadcast %c-312814405_i32 : i32 to vector<16x128xi32>
    %15 = arith.muli %13, %14 : vector<16x128xi32>
    %c11_i32 = arith.constant 11 : i32
    %16 = vector.broadcast %c11_i32 : i32 to vector<16x128xi32>
    %17 = arith.shrui %15, %16 : vector<16x128xi32>
    %18 = arith.xori %15, %17 : vector<16x128xi32>
    %c-1404298415_i32 = arith.constant -1404298415 : i32
    %19 = vector.broadcast %c-1404298415_i32 : i32 to vector<16x128xi32>
    %20 = arith.muli %18, %19 : vector<16x128xi32>
    %c15_i32 = arith.constant 15 : i32
    %21 = vector.broadcast %c15_i32 : i32 to vector<16x128xi32>
    %22 = arith.shrui %20, %21 : vector<16x128xi32>
    %23 = arith.xori %20, %22 : vector<16x128xi32>
    %c830770091_i32 = arith.constant 830770091 : i32
    %24 = vector.broadcast %c830770091_i32 : i32 to vector<16x128xi32>
    %25 = arith.muli %23, %24 : vector<16x128xi32>
    %c14_i32 = arith.constant 14 : i32
    %26 = vector.broadcast %c14_i32 : i32 to vector<16x128xi32>
    %27 = arith.shrui %25, %26 : vector<16x128xi32>
    %28 = arith.xori %25, %27 : vector<16x128xi32>
    %c-2147483648_i32 = arith.constant -2147483648 : i32
    %29 = vector.broadcast %c-2147483648_i32 : i32 to vector<16x128xi32>
    %30 = arith.cmpi ugt, %28, %29 : vector<16x128xi32>
    %c0_0 = arith.constant 0 : index
    %c0_1 = arith.constant 0 : index
    %31 = vector.load %arg2[%c0_0, %c0_1] : memref<16x128xf32, #tpu.memory_space<vmem>>, vector<16x128xf32>
    %cst = arith.constant 2.000000e+00 : f32
    %32 = vector.broadcast %cst : f32 to vector<16x128xf32>
    %33 = arith.mulf %31, %32 : vector<16x128xf32>
    %cst_2 = arith.constant 0.000000e+00 : f32
    %34 = vector.broadcast %cst_2 : f32 to vector<16x128xf32>
    %35 = arith.select %30, %33, %34 : vector<16x128xi1>, vector<16x128xf32>
    %c0_3 = arith.constant 0 : index
    %c0_4 = arith.constant 0 : index
    %36 = vector.load %arg3[%c0_3, %c0_4] : memref<16x128xf32, #tpu.memory_space<vmem>>, vector<16x128xf32>
    tpu.vector_store %arg3[%c0_3, %c0_4], %35 {strides = array<i32>} : memref<16x128xf32, #tpu.memory_space<vmem>>, vector<16x128xf32>,
    return
  }
  func.func @transform_0(%arg0: i32) -> i32 {
    %c0_i32 = arith.constant 0 : i32
    %c0_i32_0 = arith.constant 0 : i32
    return %c0_i32 : i32
  }
  func.func @transform_1(%arg0: i32) -> (i32, i32) {
    %c0_i32 = arith.constant 0 : i32
    %c0_i32_0 = arith.constant 0 : i32
    return %arg0, %c0_i32 : i32, i32
  }
  func.func @transform_2(%arg0: i32) -> (i32, i32) {
    %c0_i32 = arith.constant 0 : i32
    %c0_i32_0 = arith.constant 0 : i32
    return %arg0, %c0_i32 : i32, i32
  }
}

</mosaic_0001>

<bundles_post_ra>
// kernel: tpu_custom_call.1
= control target key start
LH: loop header
LB: loop body
LE: loop exit
PB: predicated region body
PF: predicated region fallthrough
CT: control target
= control target key end

     0   :  { %8 = vsyncpa [#allocation4], 0  ;;  %s193_s0 = inlined_call_operand.<no memory space> [shape: s32[1], index: 0, kind: input, shape index: {}]   ;;  %s194_s1 = inlined_call_operand.hbm [shape: f32[16,128], index: 1, kind: input, shape index: {}]   ;;  %s195_s2 = inlined_call_operand.hbm [shape: f32[16,128], index: 2, kind: output, shape index: {}]  }
   0x1   :  { %9 = vsyncpa [#allocation5], 0  ;;  %s16_s11 = sshll.u32 %s194_s1, 4  ;;  %s159_s12 = smov [#allocation3]   ;;  %s17_s11 = int_to_ptr.hbm [resolvable:$true] %s16_s11 }
   0x2   :  { %s18_s13 = sshll.u32 %s159_s12, 4  ;;  %s160_s14 = smov 128   ;;  %s19_s13 = int_to_ptr.vmem [resolvable:$true] %s18_s13 }
   0x3   :  { %s161_s15 = smov 8  }
   0x4   :  { %24 = dma.hbm_to_vmem [thread:$0]  %s17_s11, 256, %s19_s13, [#allocation4], %s160_s14, %s160_s14, %s161_s15  }
   0x5   :  { %155 = dma.done.wait [#allocation4], 256  }
   0x6   :  { %156 = vsyncadd [#allocation4], 4294967040  ;;  %v29_v0 = vlaneseq  ;;  %v43_v5 = vstv %s193_s0  ;;  %v74_v29 = vld [vmem:[#allocation3] sm:$0xff]  ;;  %v75_v33 = vld [vmem:[#allocation3 + $0x8] sm:$0xff]  ;;  %s162_s0 = smov [#allocation6]   ;;  %s88_s20 = sshll.u32 %s195_s2, 4  ;;  %s89_s20 = int_to_ptr.hbm [resolvable:$true] %s88_s20 }
   0x7   :  { %v76_v34 = vmul.f32 2.0, %v74_v29  ;;  %v77_v37 = vmul.f32 2.0, %v75_v33  ;;  %s86_s1 = sshll.u32 %s162_s0, 4  ;;  %s87_s1 = int_to_ptr.vmem [resolvable:$true] %s86_s1 }
   0x8   :  { %v30_v1 = vshrl.u32 %v29_v0, 7  ;;  %v33_v2 = vand.u32 127, %v29_v0 }
   0xa   :  { %v38_v3 = vmul.u32 128, %v30_v1  ;;  %v31_v4 = vadd.s32 8, %v30_v1 }
   0xc   :  { %v40_v6 = vadd.s32 %v38_v3, %v33_v2  ;;  %v39_v7 = vmul.u32 128, %v31_v4 }
   0xe   :  { %v44_v8 = vadd.s32 %v43_v5, %v40_v6  ;;  %v41_v9 = vadd.s32 %v39_v7, %v33_v2 }
  0x10   :  { %v46_v10 = vshrl.u32 %v44_v8, 17  ;;  %v45_v11 = vadd.s32 %v43_v5, %v41_v9 }
  0x12   :  { %v48_v12 = vxor.u32 %v46_v10, %v44_v8  ;;  %v47_v13 = vshrl.u32 %v45_v11, 17 }
  0x14   :  { %v50_v14 = vmul.u32 3982152891, %v48_v12  ;;  %v49_v15 = vxor.u32 %v47_v13, %v45_v11 }
  0x16   :  { %v52_v16 = vshrl.u32 %v50_v14, 11  ;;  %v51_v17 = vmul.u32 3982152891, %v49_v15 }
  0x18   :  { %v54_v18 = vxor.u32 %v52_v16, %v50_v14  ;;  %v53_v19 = vshrl.u32 %v51_v17, 11 }
  0x1a   :  { %v56_v20 = vmul.u32 2890668881, %v54_v18  ;;  %v55_v21 = vxor.u32 %v53_v19, %v51_v17 }
  0x1c   :  { %v58_v22 = vshrl.u32 %v56_v20, 15  ;;  %v57_v23 = vmul.u32 2890668881, %v55_v21 }
  0x1e   :  { %v60_v24 = vxor.u32 %v58_v22, %v56_v20  ;;  %v59_v25 = vshrl.u32 %v57_v23, 15 }
  0x20   :  { %v62_v26 = vmul.u32 830770091, %v60_v24  ;;  %v61_v27 = vxor.u32 %v59_v25, %v57_v23 }
  0x22   :  { %v64_v28 = vshrl.u32 %v62_v26, 14  ;;  %v63_v30 = vmul.u32 830770091, %v61_v27 }
  0x24   :  { %v66_v31 = vxor.u32 %v64_v28, %v62_v26  ;;  %v65_v32 = vshrl.u32 %v63_v30, 14 }
  0x26   :  { %v101_v35 = vxor.u32 2147483648, %v66_v31  ;;  %v67_v36 = vxor.u32 %v65_v32, %v63_v30 }
  0x28   :  { %vm70_vm0 = vcmp.gt.s32.totalorder %v101_v35, 0  ;;  %v102_v38 = vxor.u32 2147483648, %v67_v36 }
  0x29   :  { %v78_v39 = vsel %vm70_vm0, %v76_v34, 0.0 }
  0x2a   :  { %80 = vst [vmem:[#allocation6] sm:$0xff] %v78_v39  ;;  %vm73_vm1 = vcmp.gt.s32.totalorder %v102_v38, 0 }
  0x2b   :  { %v79_v40 = vsel %vm73_vm1, %v77_v37, 0.0 }
  0x2c   :  { %81 = vst [vmem:[#allocation6 + $0x8] sm:$0xff] %v79_v40 }
  0x2d   :  { %94 = dma.vmem_to_hbm [thread:$0]  %s87_s1, 256, %s89_s20, [#allocation5], %s160_s14, %s160_s14, %s161_s15  }
  0x2e   :  { %157 = dma.done.wait [#allocation5], 256  }
  0x2f   :  { %158 = vsyncadd [#allocation5], 4294967040 }
  0x30   :  { %99 = vsyncpa [#allocation4], 1 }
  0x31   :  { %100 = vsyncpa [#allocation5], 1 }

</bundles_post_ra>
